<compile_context>
chip_gen: v7x
topology: tpu7x:2x2x1
jax: 0.10.0
libtpu: 0.0.40
codegen_flags: <defaults>
</compile_context>

<pallas_src>
import functools
import math

import jax
import jax.numpy as jnp
from jax import lax
from jax.experimental import pallas as pl
from jax.experimental.pallas import tpu as pltpu


_TARGET_BLOCK_BYTES = 6 * 1024 * 1024      # ~6 MiB per input block
_VMEM_LIMIT_BYTES = 48 * 1024 * 1024       # 4 x block (in+out, 2-deep) + consts
_MAX_PACKED_LANES = 512                    # cap on lcm(D, 128) for the packed path


def _round_up(n, m):
    return ((n + m - 1) // m) * m


def _pick_block_rows(total_rows, vmem_bytes_per_row, block_rows):
    if block_rows is not None:
        tb = max(8, (int(block_rows) // 8) * 8)
    else:
        tb = max(8, (_TARGET_BLOCK_BYTES // vmem_bytes_per_row) // 8 * 8)
        # Guarantee >= 2 grid steps when possible so v7x's two TensorCores both
        # get work (no-op on single-core v5e/v6e).
        half = _round_up(-(-total_rows // 2), 8)
        tb = min(tb, half)
    tb = min(tb, _round_up(total_rows, 8))
    return max(tb, 8)


# -----------------------------------------------------------------------------
# Lane-dense packed path (lanes = lcm(D, 128) <= _MAX_PACKED_LANES).
# -----------------------------------------------------------------------------
def _vp_packed_kernel(x_ref, wscat_ref, sel_ref, o_ref, *, nan_safe):
    x = x_ref[...].astype(jnp.float32)                 # (tb, lanes)
    # sigmoid via a single EUP transcendental (halves EUP work vs exp + divide).
    s = 0.5 * jnp.tanh(0.5 * x) + 0.5
    if nan_safe:
        # Explicitly exclude the mode lane so NaN/Inf there cannot propagate.
        s = jnp.where(sel_ref[...] > 0.5, 0.0, s)
    # One MXU matmul against a constant block-diagonal matrix (weights folded
    # in on the host) performs the weighted per-group feature sum AND scatters
    # the result onto the `mode` lane of each group.  The mode lane's own
    # contribution is zero because its weight row is zero.
    add = jnp.dot(s, wscat_ref[...], preferred_element_type=jnp.float32)
    o_ref[...] = (x + add).astype(o_ref.dtype)


def _vp_packed(xp, wscat, sel, block_rows, nan_safe):
    rows, lanes = xp.shape
    tb = _pick_block_rows(rows, lanes * 4, block_rows)
    grid = pl.cdiv(rows, tb)                           # ragged last block, no padding
    return pl.pallas_call(
        functools.partial(_vp_packed_kernel, nan_safe=nan_safe),
        out_shape=jax.ShapeDtypeStruct((rows, lanes), xp.dtype),
        grid_spec=pl.GridSpec(
            grid=(grid,),
            in_specs=[
                pl.BlockSpec((tb, lanes), lambda i: (i, 0)),
                pl.BlockSpec((lanes, lanes), lambda i: (0, 0)),   # resident const
                pl.BlockSpec((1, lanes), lambda i: (0, 0)),       # resident const
            ],
            out_specs=pl.BlockSpec((tb, lanes), lambda i: (i, 0)),
        ),
        compiler_params=pltpu.CompilerParams(
            dimension_semantics=("parallel",),
            vmem_limit_bytes=_VMEM_LIMIT_BYTES,
        ),
    )(xp, wscat, sel)


# -----------------------------------------------------------------------------
# Row-tiled fallback for very wide feature dims (lane utilisation D/round_up(D,128)).
# -----------------------------------------------------------------------------
def _vp_rowwise_kernel(x_ref, w_ref, oh_ref, o_ref, *, nan_safe):
    x = x_ref[...].astype(jnp.float32)                 # (tb, D)
    oh = oh_ref[...]                                   # (1, D) one-hot at `mode`
    s = 0.5 * jnp.tanh(0.5 * x) + 0.5
    if nan_safe:
        s = jnp.where(oh > 0.5, 0.0, s)
    add = jnp.sum(s * w_ref[...], axis=-1, keepdims=True)   # w[mode] == 0
    o_ref[...] = (x + add * oh).astype(o_ref.dtype)


def _vp_rowwise(xb, w_row, mode, block_rows, nan_safe):
    B, D = xb.shape
    tb = _pick_block_rows(B, _round_up(D, 128) * 4, block_rows)
    w = w_row.reshape(1, D)
    oh = jnp.zeros((D,), jnp.float32).at[mode].set(1.0).reshape(1, D)
    return pl.pallas_call(
        functools.partial(_vp_rowwise_kernel, nan_safe=nan_safe),
        out_shape=jax.ShapeDtypeStruct((B, D), xb.dtype),
        grid_spec=pl.GridSpec(
            grid=(pl.cdiv(B, tb),),                    # ragged last block, no padding
            in_specs=[
                pl.BlockSpec((tb, D), lambda i: (i, 0)),
                pl.BlockSpec((1, D), lambda i: (0, 0)),
                pl.BlockSpec((1, D), lambda i: (0, 0)),
            ],
            out_specs=pl.BlockSpec((tb, D), lambda i: (i, 0)),
        ),
        compiler_params=pltpu.CompilerParams(
            dimension_semantics=("parallel",),
            vmem_limit_bytes=_VMEM_LIMIT_BYTES,
        ),
    )(xb, w, oh)


def _vp_tail(xt, w_row, oh_row):
    """Plain-JAX path for the <= pack-1 trailing rows (avoids whole-array pad/slice)."""
    x = xt.astype(jnp.float32)
    s = jax.nn.sigmoid(x)
    s = jnp.where(oh_row > 0.5, 0.0, s)
    add = jnp.sum(s * w_row, axis=-1, keepdims=True)
    return (x + add * oh_row).astype(xt.dtype)


@functools.partial(jax.jit, static_argnames=("mode", "block_rows", "nan_safe"))
def vp_activation(x, a, mode=0, block_rows=None, nan_safe=False):
    """x: (..., D) array, a: (D-1, 1) parameter.  Returns array of same shape as x."""
    orig_shape = x.shape
    D = orig_shape[-1]
    mode = int(mode)
    xb = x.reshape(-1, D)
    B = xb.shape[0]

    # (D,) weight row with a zero at column `mode`: a masked full-width reduction
    # then equals the reference's reduction over q (x without column mode).
    a_flat = a.reshape(-1).astype(jnp.float32)
    w_row = jnp.concatenate(
        [a_flat[:mode], jnp.zeros((1,), jnp.float32), a_flat[mode:]], axis=0)
    onehot = jnp.zeros((D,), jnp.float32).at[mode].set(1.0)

    lanes = D * 128 // math.gcd(D, 128)                # lcm(D, 128)
    if lanes <= _MAX_PACKED_LANES:
        pack = lanes // D                              # logical rows per packed row
        rows = B // pack
        n_main = rows * pack
        pieces = []
        if rows > 0:
            xp = xb[:n_main].reshape(rows, lanes)      # bit-exact repack; free when n_main == B
            blk = jnp.outer(w_row, onehot)             # (D, D): column `mode` = w_row
            wscat = jnp.kron(jnp.eye(pack, dtype=jnp.float32), blk)  # (lanes, lanes)
            sel = jnp.tile(onehot, pack).reshape(1, lanes)
            out_main = _vp_packed(xp, wscat, sel, block_rows, nan_safe)
            pieces.append(out_main.reshape(n_main, D))
        if n_main < B:
            pieces.append(_vp_tail(xb[n_main:], w_row.reshape(1, D), onehot.reshape(1, D)))
        out = pieces[0] if len(pieces) == 1 else jnp.concatenate(pieces, axis=0)
    else:
        # TODO(synk): very wide features (lcm(D,128) > 512) use a row-tiled kernel;
        # its lane utilisation D/round_up(D,128) is already decent for large D.
        out = _vp_rowwise(xb, w_row, mode, block_rows, nan_safe)
    return out.reshape(orig_shape)


def vp_activation_ref(x, a, mode=0):
    """Pure-JAX reference mirroring the PyTorch forward exactly (f32-precise dot)."""
    i = mode
    p = x[..., i:i + 1]
    q = jnp.concatenate([x[..., :i], x[..., i + 1:]], axis=-1)
    add = jnp.dot(jax.nn.sigmoid(q), a, precision=lax.Precision.HIGHEST)
    return jnp.concatenate([x[..., :i], p + add, x[..., i + 1:]], axis=-1)


if __name__ == "__main__":
    key = jax.random.PRNGKey(0)
    k_x, k_a, k_x2, k_x3, k_a3, k_x4, k_a4 = jax.random.split(key, 7)

    dim = 8
    h = 0.01

    # Case 1: module-default config (dim=8, mode=0); B divisible by pack -> packed path.
    x = jax.random.normal(k_x, (2, 4, 16, dim), dtype=jnp.float32)
    a = jax.random.normal(k_a, (dim - 1, 1), dtype=jnp.float32) * h
    out = jax.block_until_ready(vp_activation(x, a, mode=0))
    ref = vp_activation_ref(x, a, mode=0)
    assert out.shape == x.shape
    assert jnp.allclose(out, ref, atol=1e-4, rtol=1e-4), "case 1 mismatch vs reference"

    # Case 2: multi-block pipelined grid with a ragged last block, mode != 0.
    x2 = jax.random.normal(k_x2, (16, 257, dim), dtype=jnp.float32)
    out2 = jax.block_until_ready(vp_activation(x2, a, mode=3, block_rows=64))
    ref2 = vp_activation_ref(x2, a, mode=3)
    assert jnp.allclose(out2, ref2, atol=1e-4, rtol=1e-4), "case 2 mismatch vs reference"

    # Case 3: D does not divide 128 -> lane-dense super-row packing (lcm(6,128)=384
    # lanes) plus a small tail (B % pack != 0) handled in plain JAX.
    dim3 = 6
    x3 = jax.random.normal(k_x3, (4, 100, dim3), dtype=jnp.float32)
    a3 = jax.random.normal(k_a3, (dim3 - 1, 1), dtype=jnp.float32) * h
    out3 = jax.block_until_ready(vp_activation(x3, a3, mode=2, block_rows=16))
    ref3 = vp_activation_ref(x3, a3, mode=2)
    assert jnp.allclose(out3, ref3, atol=1e-4, rtol=1e-4), "case 3 mismatch vs reference"

    # Case 4: very wide feature dim -> row-tiled fallback path (ragged 2-step grid).
    dim4 = 200
    x4 = jax.random.normal(k_x4, (3, 50, dim4), dtype=jnp.float32)
    a4 = jax.random.normal(k_a4, (dim4 - 1, 1), dtype=jnp.float32) * h
    out4 = jax.block_until_ready(vp_activation(x4, a4, mode=7))
    ref4 = vp_activation_ref(x4, a4, mode=7)
    assert jnp.allclose(out4, ref4, atol=1e-4, rtol=1e-4), "case 4 mismatch vs reference"

    # Case 5: NaN-safe flag -- non-finite values in the mode column must not leak
    # into the other (unchanged) columns.
    x5 = x.at[..., 0].set(jnp.nan)
    out5 = jax.block_until_ready(vp_activation(x5, a, mode=0, nan_safe=True))
    assert bool(jnp.all(jnp.isnan(out5[..., 0]))), "case 5: mode column should stay NaN"
    assert jnp.allclose(out5[..., 1:], x[..., 1:], atol=1e-6, rtol=1e-6), \
        "case 5: NaN leaked into unchanged columns"

    print("KERNEL_OK")
</pallas_src>

<mosaic_0001>
module attributes {stable_mosaic.version = 11 : i64} {
  func.func @_vp_packed_kernel(%arg0: i32, %arg1: memref<8x128xf32, #tpu.memory_space<vmem>>, %arg2: memref<128x128xf32, #tpu.memory_space<vmem>>, %arg3: memref<1x128xf32, #tpu.memory_space<vmem>>, %arg4: memref<8x128xf32, #tpu.memory_space<vmem>>) attributes {dimension_semantics = [#tpu.dimension_semantics<parallel>], iteration_bounds = array<i64: 1>, scalar_prefetch = 0 : i64, scratch_operands = 0 : i64, tpu.core_type = #tpu.core_type<tc>, window_params = [{transform_indices = @transform_0, window_bounds = array<i64: 8, 128>}, {pipeline_mode = #tpu.pipeline_mode<synchronous>, transform_indices = @transform_1, window_bounds = array<i64: 128, 128>}, {pipeline_mode = #tpu.pipeline_mode<synchronous>, transform_indices = @transform_2, window_bounds = array<i64: 1, 128>}, {transform_indices = @transform_3, window_bounds = array<i64: 8, 128>}]} {
    %c0 = arith.constant 0 : index
    %c0_0 = arith.constant 0 : index
    %0 = vector.load %arg1[%c0, %c0_0] : memref<8x128xf32, #tpu.memory_space<vmem>>, vector<8x128xf32>
    %cst = arith.constant 5.000000e-01 : f32
    %1 = vector.broadcast %cst : f32 to vector<8x128xf32>
    %2 = arith.mulf %1, %0 : vector<8x128xf32>
    %3 = math.tanh %2 : vector<8x128xf32>
    %cst_1 = arith.constant 5.000000e-01 : f32
    %4 = vector.broadcast %cst_1 : f32 to vector<8x128xf32>
    %5 = arith.mulf %4, %3 : vector<8x128xf32>
    %cst_2 = arith.constant 5.000000e-01 : f32
    %6 = vector.broadcast %cst_2 : f32 to vector<8x128xf32>
    %7 = arith.addf %5, %6 : vector<8x128xf32>
    %c0_3 = arith.constant 0 : index
    %c0_4 = arith.constant 0 : index
    %8 = vector.load %arg2[%c0_3, %c0_4] : memref<128x128xf32, #tpu.memory_space<vmem>>, vector<128x128xf32>
    %cst_5 = arith.constant dense<0.000000e+00> : vector<8x128xf32>
    %9 = tpu.matmul %7, %8, %cst_5 {dimension_numbers = #tpu.dot_dimension_numbers<[1], [0], [0], [1], [0, 0, 1, 1], [], []>} : vector<8x128xf32>, vector<128x128xf32>, vector<8x128xf32> -> vector<8x128xf32>
    %10 = arith.addf %0, %9 : vector<8x128xf32>
    %c0_6 = arith.constant 0 : index
    %c0_7 = arith.constant 0 : index
    %11 = vector.load %arg4[%c0_6, %c0_7] : memref<8x128xf32, #tpu.memory_space<vmem>>, vector<8x128xf32>
    tpu.vector_store %arg4[%c0_6, %c0_7], %10 {strides = array<i32>} : memref<8x128xf32, #tpu.memory_space<vmem>>, vector<8x128xf32>,
    return
  }
  func.func @transform_0(%arg0: i32) -> (i32, i32) {
    %c0_i32 = arith.constant 0 : i32
    %c0_i32_0 = arith.constant 0 : i32
    return %arg0, %c0_i32 : i32, i32
  }
  func.func @transform_1(%arg0: i32) -> (i32, i32) {
    %c0_i32 = arith.constant 0 : i32
    %c0_i32_0 = arith.constant 0 : i32
    %c0_i32_1 = arith.constant 0 : i32
    return %c0_i32, %c0_i32_0 : i32, i32
  }
  func.func @transform_2(%arg0: i32) -> (i32, i32) {
    %c0_i32 = arith.constant 0 : i32
    %c0_i32_0 = arith.constant 0 : i32
    %c0_i32_1 = arith.constant 0 : i32
    return %c0_i32, %c0_i32_0 : i32, i32
  }
  func.func @transform_3(%arg0: i32) -> (i32, i32) {
    %c0_i32 = arith.constant 0 : i32
    %c0_i32_0 = arith.constant 0 : i32
    return %arg0, %c0_i32 : i32, i32
  }
}

</mosaic_0001>

<bundles_post_ra>
// kernel: tile.8
= control target key start
LH: loop header
LB: loop body
LE: loop exit
PB: predicated region body
PF: predicated region fallthrough
CT: control target
= control target key end

     0   :  { %s28_s0 = inlined_call_operand.vmem [shape: f32[8], index: 0, kind: input, shape index: {}]   ;;  %s29_s1 = inlined_call_operand.vmem [shape: f32[16,8], index: 1, kind: output, shape index: {}]  }
   0x1   :  { %v4_v0 = vld [vmem:[%s28_s0] ss:$0 sm:$0xff] }
   0x2   :  { %5 = vst [vmem:[%s29_s1] sm:$0xff] %v4_v0  ;;  %8 = vst [vmem:[%s29_s1 + $0x8] sm:$0xff] %v4_v0 }

// kernel: tile.9
= control target key start
LH: loop header
LB: loop body
LE: loop exit
PB: predicated region body
PF: predicated region fallthrough
CT: control target
= control target key end

     0   :  { %s131_s10 = smov 120   ;;  %s132_s11 = smov 104   ;;  %vm3_vm0 = vcmask 64512   ;;  %vm9_vm1 = vcmask 1048512   ;;  %vm15_vm2 = vcmask 982912   ;;  %vm21_vm3 = vcmask 917312   ;;  %s207_s0 = inlined_call_operand.vmem [shape: f32[16,8], index: 0, kind: input, shape index: {}]   ;;  %s208_s1 = inlined_call_operand.vmem [shape: f32[1,128], index: 1, kind: output, shape index: {}]  }
   0x1   :  { %v101_v0 = vld [vmem:[%s207_s0 + $0xf] sm:$0x1]   ;;  %v103_v1 = vld [vmem:[%s207_s0 + $0xd] sm:$0x1]   ;;  %v102_v2 = vld [vmem:[%s207_s0 + $0xe] sm:$0x1]  }
   0x2   :  { %7 = vrot.lane.b32.xlu0 %v101_v0, %s131_s10  ;;  %19 = vrot.lane.b32.xlu1 %v103_v1, %s132_s11  ;;  %v104_v3 = vld [vmem:[%s207_s0 + $0xc] sm:$0x1]   ;;  %s133_s16 = smov 112   ;;  %s134_s17 = smov 96   ;;  %v105_v4 = vld [vmem:[%s207_s0 + $0xb] sm:$0x1]  }
   0x3   :  { %v106_v5 = vld [vmem:[%s207_s0 + $0xa] sm:$0x1]   ;;  %v2_v6 = vld [vmem:[%s207_s0] sm:$0x1]   ;;  %s135_s24 = smov 88   ;;  %s136_s25 = smov 80  }
   0x4   :  { %4 = vst.msk [vmem:[#allocation0] sm:$0x1] %vm3_vm0, %v2_v6   ;;  %v107_v7 = vld [vmem:[%s207_s0 + $0x9] sm:$0x1]   ;;  %v108_v8 = vld [vmem:[%s207_s0 + $0x8] sm:$0x1]  }
   0x5   :  { %s137_s30 = smov 72   ;;  %s138_s2 = smov 64   ;;  %v109_v9 = vld [vmem:[%s207_s0 + $0x7] sm:$0x1]   ;;  %v110_v10 = vld [vmem:[%s207_s0 + $0x6] sm:$0x1]  }
   0x6   :  { %13 = vrot.lane.b32.xlu0 %v102_v2, %s133_s16  ;;  %25 = vrot.lane.b32.xlu1 %v104_v3, %s134_s17  ;;  %s139_s7 = smov 56   ;;  %s140_s8 = smov 48   ;;  %v111_v11 = vld [vmem:[%s207_s0 + $0x5] sm:$0x1]   ;;  %v112_v12 = vld [vmem:[%s207_s0 + $0x4] sm:$0x1]  }
   0x7   :  { %s141_s13 = smov 40   ;;  %s142_s14 = smov 32   ;;  %v113_v13 = vld [vmem:[%s207_s0 + $0x3] sm:$0x1]   ;;  %v114_v14 = vld [vmem:[%s207_s0 + $0x2] sm:$0x1]  }
   0x8   :  { %s143_s19 = smov 24   ;;  %s144_s20 = smov 16   ;;  %v115_v15 = vld [vmem:[%s207_s0 + $0x1] sm:$0x1]   ;;  %vm27_vm4 = vcmask 851712   ;;  %vm33_vm5 = vcmask 786112  }
   0x9   :  { %s145_s0 = smov 8   ;;  %vm39_vm6 = vcmask 720512   ;;  %vm45_vm7 = vcmask 654912   ;;  %vm51_vm8 = vcmask 589312   ;;  %vm57_vm9 = vcmask 523712  }
   0xa   :  { %31 = vrot.lane.b32.xlu0 %v105_v4, %s135_s24  ;;  %37 = vrot.lane.b32.xlu1 %v106_v5, %s136_s25  ;;  %vm63_vm10 = vcmask 458112   ;;  %vm69_vm11 = vcmask 392512   ;;  %vm75_vm12 = vcmask 326912   ;;  %vm81_vm13 = vcmask 261312  }
   0xb   :  { %vm87_vm14 = vcmask 195712   ;;  %vm93_vm15 = vcmask 130112  }
   0xe   :  { %43 = vrot.lane.b32.xlu0 %v107_v7, %s137_s30  ;;  %49 = vrot.lane.b32.xlu1 %v108_v8, %s138_s2 }
  0x12   :  { %55 = vrot.lane.b32.xlu0 %v109_v9, %s139_s7  ;;  %61 = vrot.lane.b32.xlu1 %v110_v10, %s140_s8 }
  0x16   :  { %67 = vrot.lane.b32.xlu0 %v111_v11, %s141_s13  ;;  %73 = vrot.lane.b32.xlu1 %v112_v12, %s142_s14 }
  0x1a   :  { %79 = vrot.lane.b32.xlu0 %v113_v13, %s143_s19  ;;  %85 = vrot.lane.b32.xlu1 %v114_v14, %s144_s20 }
  0x1e   :  { %91 = vrot.lane.b32.xlu0 %v115_v15, %s145_s0 }
  0x74   :  { %v8_v16 = vpop.permute.xlu0 %7   ;;  %v20_v17 = vpop.permute.xlu1 %19  }
  0x75   :  { %10 = vst.msk [vmem:[#allocation0] sm:$0x1] %vm9_vm1, %v8_v16  }
  0x78   :  { %v14_v18 = vpop.permute.xlu0 %13   ;;  %v26_v19 = vpop.permute.xlu1 %25  }
  0x79   :  { %16 = vst.msk [vmem:[#allocation0] sm:$0x1] %vm15_vm2, %v14_v18  }
  0x7a   :  { %22 = vst.msk [vmem:[#allocation0] sm:$0x1] %vm21_vm3, %v20_v17  }
  0x7b   :  { %28 = vst.msk [vmem:[#allocation0] sm:$0x1] %vm27_vm4, %v26_v19  }
  0x7c   :  { %v32_v20 = vpop.permute.xlu0 %31   ;;  %v38_v21 = vpop.permute.xlu1 %37  }
  0x7d   :  { %34 = vst.msk [vmem:[#allocation0] sm:$0x1] %vm33_vm5, %v32_v20  }
  0x7e   :  { %40 = vst.msk [vmem:[#allocation0] sm:$0x1] %vm39_vm6, %v38_v21  }
  0x80   :  { %v44_v22 = vpop.permute.xlu0 %43   ;;  %v50_v23 = vpop.permute.xlu1 %49  }
  0x81   :  { %46 = vst.msk [vmem:[#allocation0] sm:$0x1] %vm45_vm7, %v44_v22  }
  0x82   :  { %52 = vst.msk [vmem:[#allocation0] sm:$0x1] %vm51_vm8, %v50_v23  }
  0x84   :  { %v56_v24 = vpop.permute.xlu0 %55   ;;  %v62_v25 = vpop.permute.xlu1 %61  }
  0x85   :  { %58 = vst.msk [vmem:[#allocation0] sm:$0x1] %vm57_vm9, %v56_v24  }
  0x86   :  { %64 = vst.msk [vmem:[#allocation0] sm:$0x1] %vm63_vm10, %v62_v25  }
  0x88   :  { %v68_v26 = vpop.permute.xlu0 %67   ;;  %v74_v27 = vpop.permute.xlu1 %73  }
  0x89   :  { %70 = vst.msk [vmem:[#allocation0] sm:$0x1] %vm69_vm11, %v68_v26  }
  0x8a   :  { %76 = vst.msk [vmem:[#allocation0] sm:$0x1] %vm75_vm12, %v74_v27  }
  0x8c   :  { %v80_v28 = vpop.permute.xlu0 %79   ;;  %v86_v29 = vpop.permute.xlu1 %85  }
  0x8d   :  { %82 = vst.msk [vmem:[#allocation0] sm:$0x1] %vm81_vm13, %v80_v28  }
  0x8e   :  { %88 = vst.msk [vmem:[#allocation0] sm:$0x1] %vm87_vm14, %v86_v29  }
  0x90   :  { %v92_v30 = vpop.permute.xlu0 %91  }
  0x91   :  { %94 = vst.msk [vmem:[#allocation0] sm:$0x1] %vm93_vm15, %v92_v30  }
  0x98   :  { %v98_v31 = vld [vmem:[#allocation0] sm:$0x1] }
  0x99   :  { %100 = vst [vmem:[%s208_s1] sm:$0x1] %v98_v31 }

// kernel: vp_activation.1
= control target key start
LH: loop header
LB: loop body
LE: loop exit
PB: predicated region body
PF: predicated region fallthrough
CT: control target
= control target key end

     0   :  { %v192_v0 = vmov 0.0|0.0   ;;  %vm193_vm0 = vmmov 0   ;;  %v194_v4 = vmov 0.0   ;;  %s269_s2 = inlined_call_operand.vmem [shape: f32[1,128], index: 2, kind: input, shape index: {}]   ;;  %s270_s1 = inlined_call_operand.vmem [shape: f32[128,128], index: 1, kind: input, shape index: {}]   ;;  %s271_s0 = inlined_call_operand.vmem [shape: f32[8,128], index: 0, kind: input, shape index: {}]   ;;  %s272_s3 = inlined_call_operand.vmem [shape: f32[8,128], index: 3, kind: output, shape index: {}]  }
   0x1   :  { %163 = vmatprep.subr.bf16.mxu0 %v192_v0  ;;  %v19_v1 = vld [vmem:[%s270_s1] sm:$0xff]  ;;  %v20_v2 = vld [vmem:[%s270_s1 + $0x8] sm:$0xff]  ;;  %v21_v3 = vld [vmem:[%s270_s1 + $0x10] sm:$0xff]  ;;  %160 = vmatprep.mubr.msk.f32.mxu0 %vm193_vm0, %v194_v4 }
   0x2   :  { %v164_v5 = vpack.c.bf16 %v20_v2, %v19_v1  ;;  %v22_v6 = vld [vmem:[%s270_s1 + $0x18] sm:$0xff]  ;;  %v23_v8 = vld [vmem:[%s270_s1 + $0x20] sm:$0xff]  ;;  %v24_v9 = vld [vmem:[%s270_s1 + $0x28] sm:$0xff] }
   0x3   :  { %v167_v7 = vpack.c.bf16 %v22_v6, %v21_v3  ;;  %v14_v10 = vld [vmem:[%s271_s0] sm:$0xff]  ;;  %v170_v11 = vpack.c.bf16 %v24_v9, %v23_v8  ;;  %v25_v12 = vld [vmem:[%s270_s1 + $0x30] sm:$0xff]  ;;  %v26_v13 = vld [vmem:[%s270_s1 + $0x38] sm:$0xff] }
   0x4   :  { %165 = vmatpush3.bf16.msra.mxu0 %v164_v5  ;;  %v15_v14 = vmul.f32 0.5, %v14_v10  ;;  %v173_v15 = vpack.c.bf16 %v26_v13, %v25_v12  ;;  %v27_v16 = vld [vmem:[%s270_s1 + $0x40] sm:$0xff]  ;;  %v28_v17 = vld [vmem:[%s270_s1 + $0x48] sm:$0xff]  ;;  %v29_v19 = vld [vmem:[%s270_s1 + $0x50] sm:$0xff] }
   0x5   :  { %166 = vmatprep.subr.bf16.mxu0 %v192_v0  ;;  %v176_v18 = vpack.c.bf16 %v28_v17, %v27_v16  ;;  %v30_v20 = vld [vmem:[%s270_s1 + $0x58] sm:$0xff]  ;;  %v31_v22 = vld [vmem:[%s270_s1 + $0x60] sm:$0xff]  ;;  %v32_v23 = vld [vmem:[%s270_s1 + $0x68] sm:$0xff] }
   0x6   :  { %190 = vtanh.f32 %v15_v14  ;;  %v179_v21 = vpack.c.bf16 %v30_v20, %v29_v19  ;;  %v182_v25 = vpack.c.bf16 %v32_v23, %v31_v22  ;;  %v33_v26 = vld [vmem:[%s270_s1 + $0x70] sm:$0xff]  ;;  %v34_v27 = vld [vmem:[%s270_s1 + $0x78] sm:$0xff] }
   0x7   :  { %v185_v29 = vpack.c.bf16 %v34_v27, %v33_v26 }
   0x8   :  { %168 = vmatpush3.bf16.msra.mxu0 %v167_v7 }
   0x9   :  { %169 = vmatprep.subr.bf16.mxu0 %v192_v0 }
   0xc   :  { %171 = vmatpush3.bf16.msra.mxu0 %v170_v11 }
   0xd   :  { %172 = vmatprep.subr.bf16.mxu0 %v192_v0 }
  0x10   :  { %174 = vmatpush3.bf16.msra.mxu0 %v173_v15  ;;  %v191_v24 = vpop.eup %190 }
  0x11   :  { %175 = vmatprep.subr.bf16.mxu0 %v192_v0  ;;  %v17_v28 = vmul.f32 0.5, %v191_v24 }
  0x13   :  { %v18_v30 = vadd.f32 0.5, %v17_v28 }
  0x14   :  { %177 = vmatpush3.bf16.msra.mxu0 %v176_v18 }
  0x15   :  { %178 = vmatprep.subr.bf16.mxu0 %v192_v0 }
  0x18   :  { %180 = vmatpush3.bf16.msra.mxu0 %v179_v21 }
  0x19   :  { %181 = vmatprep.subr.bf16.mxu0 %v192_v0 }
  0x1c   :  { %183 = vmatpush3.bf16.msra.mxu0 %v182_v25 }
  0x1d   :  { %184 = vmatprep.subr.bf16.mxu0 %v192_v0 }
  0x20   :  { %186 = vmatpush3.bf16.msra.mxu0 %v185_v29 }
  0x23   :  { %161 = vmatmul.mubr.f32.vlgmr.msra.gmra.mrb[0].mxu0 %v18_v30 }
  0xf6   :  { %v101_v31 = vpop.f32.mrb[0].mxu0 }
  0xf7   :  { %v105_v32 = vadd.f32 %v101_v31, %v14_v10  ;;  %v162_v33 = vpop.f32.mrb[1].mxu0 }
  0xf9   :  { %106 = vst [vmem:[%s272_s3] sm:$0xff] %v105_v32 }

</bundles_post_ra>
